<compile_context>
chip_gen: v6e
topology: v6e:2x2x1
jax: 0.10.0
libtpu: 0.0.40
codegen_flags: <defaults>
</compile_context>

<pallas_src>
import math

import jax
import jax.numpy as jnp
from jax.experimental import pallas as pl
from jax.experimental.pallas import tpu as pltpu


# --------------------------------------------------------------------------- #
# Sinusoidal positional-encoding buffer (matches the PyTorch module exactly). #
# --------------------------------------------------------------------------- #
def _build_pe(d_model: int, max_len: int) -> jnp.ndarray:
    """pe[:, 0::2] = sin(pos * div_term); pe[:, 1::2] = cos(pos * div_term)."""
    assert d_model % 2 == 0, "d_model must be even (as the torch module assumes)"
    position = jnp.arange(max_len, dtype=jnp.float32)[:, None]            # (L, 1)
    div_term = jnp.exp(
        jnp.arange(0, d_model, 2, dtype=jnp.float32) * (-math.log(10000.0) / d_model)
    )                                                                      # (D/2,)
    angles = position * div_term                                           # (L, D/2)
    pe = jnp.stack([jnp.sin(angles), jnp.cos(angles)], axis=-1)            # (L, D/2, 2)
    return pe.reshape(max_len, d_model)                                    # (L, D)


# -------------------------------- kernel body ------------------------------ #
def _pe_add_kernel(x_ref, pe_ref, o_ref):
    # x_ref / o_ref: (kb, ts, d_f); pe_ref: (ts, d_f) — broadcast over the packed-batch dim.
    o_ref[...] = (x_ref[...] + pe_ref[...]).astype(o_ref.dtype)


# ------------------------------ tiling helpers ----------------------------- #
def _vmem_budget() -> tuple[int, int]:
    """Returns (per-block target bytes, vmem_limit_bytes), generation-aware."""
    cap = None
    try:
        cap = getattr(pltpu.get_tpu_info(), "vmem_capacity_bytes", None)
    except Exception:
        cap = None
    if not cap:
        cap = 64 * 1024 * 1024  # conservative: v7x per-TensorCore VMEM
    cap = int(cap)
    # 48 MiB scoped limit on 64 MiB parts (v7x), 64 MiB on 128 MiB parts (v5e/v6e).
    vmem_limit = max(32 * 1024 * 1024, min(64 * 1024 * 1024, cap - 16 * 1024 * 1024))
    # 3 streams (x, pe, out) double-buffered ≈ 6 resident blocks -> limit/8 per block.
    target = max(2 * 1024 * 1024, vmem_limit // 8)
    return target, vmem_limit


def _lane_fold_factor(d: int, lanes: int = 128) -> int:
    """Smallest sr with (sr * d) % lanes == 0 (fold sr seq rows into the lane axis)."""
    return lanes // math.gcd(d, lanes)


def _choose_tiles(b: int, s_f: int, d_f: int, itemsize: int, target_bytes: int):
    """Pick (kb, ts, sub): kb batch elements and ts folded seq rows per grid block."""
    sub = max(8, 32 // itemsize)                  # native sublane packing: f32=8, bf16=16, i8=32
    row_bytes = d_f * itemsize
    ts_target = max(sub, (target_bytes // row_bytes // sub) * sub)

    if s_f <= ts_target:
        ts = s_f                                   # full extent: (8,128) rule satisfied trivially
    else:
        # Prefer the largest divisor of s_f that is a multiple of `sub`
        # (no ragged last seq tile -> no masked-store step).
        ts = 0
        cand = (ts_target // sub) * sub
        while cand >= sub:
            if s_f % cand == 0:
                ts = cand
                break
            cand -= sub
        if ts == 0:
            ts = (ts_target // sub) * sub          # ragged last tile: correct, masked there only

    # Pack multiple batch elements per block when one sequence slab is small,
    # so the fixed per-grid-step overhead is amortized.
    kb = 1
    if ts == s_f:
        kb_max = min(b, max(1, target_bytes // max(1, s_f * row_bytes)))
        for cand in range(kb_max, 0, -1):          # prefer a divisor of b
            if b % cand == 0:
                kb = cand
                break
    return kb, ts, sub


# --------------------------------- wrapper --------------------------------- #
def positional_encoding(x: jnp.ndarray, pe: jnp.ndarray) -> jnp.ndarray:
    """x: (B, S, D); pe: (max_len, D). Returns x + pe[:S], broadcast over batch."""
    b, s, d = x.shape
    if s > pe.shape[0]:
        raise ValueError(f"seq_len={s} exceeds positional-encoding max_len={pe.shape[0]}")

    itemsize = jnp.dtype(x.dtype).itemsize
    # Cast once in the wrapper so the in-kernel add stays in x.dtype (bf16 stays bf16).
    pe_slice = pe[:s, :].astype(x.dtype)

    # ---- lane folding: make the last dim a multiple of 128 (unmasked stores) ----
    sr = _lane_fold_factor(d)                      # sr == 1 when d % 128 == 0
    s_pad = ((s + sr - 1) // sr) * sr
    if s_pad != s:
        # Hardened fallback: zero-pad the seq dim so the fold always applies
        # (one extra pass over x; only triggers when sr does not divide S).
        x = jnp.pad(x, ((0, 0), (0, s_pad - s), (0, 0)))
        pe_slice = jnp.pad(pe_slice, ((0, s_pad - s), (0, 0)))
    s_f, d_f = s_pad // sr, sr * d
    x_f = x.reshape(b, s_f, d_f)                   # contiguous reshape (free)
    pe_f = pe_slice.reshape(s_f, d_f)

    # ---- generation-aware tiling ----
    target_bytes, vmem_limit = _vmem_budget()
    kb, ts, sub = _choose_tiles(b, s_f, d_f, itemsize, target_bytes)

    n_seq = pl.cdiv(s_f, ts)
    n_b = pl.cdiv(b, kb)
    # v7x has 2 TensorCores: if everything collapsed into one (large) block, split it
    # so both cores get work.  Skip for tiny inputs where a split is pure overhead.
    if n_seq * n_b == 1 and kb * ts * d_f * itemsize >= (512 << 10):
        if kb >= 2:
            kb = pl.cdiv(kb, 2)
        elif s_f >= 2 * sub:
            ts = min(s_f, ((pl.cdiv(s_f, 2) + sub - 1) // sub) * sub)
        n_seq = pl.cdiv(s_f, ts)
        n_b = pl.cdiv(b, kb)

    out = pl.pallas_call(
        _pe_add_kernel,
        out_shape=jax.ShapeDtypeStruct((b, s_f, d_f), x.dtype),
        grid_spec=pltpu.PrefetchScalarGridSpec(
            num_scalar_prefetch=0,
            # seq-tile OUTER, batch INNER: pe's block index is constant across the
            # inner batch sweep, so its DMA is issued once per seq tile.
            grid=(n_seq, n_b),
            in_specs=[
                pl.BlockSpec((kb, ts, d_f), lambda j, i: (i, j, 0)),   # x tile
                pl.BlockSpec((ts, d_f), lambda j, i: (j, 0)),          # pe tile
            ],
            out_specs=pl.BlockSpec((kb, ts, d_f), lambda j, i: (i, j, 0)),
        ),
        compiler_params=pltpu.CompilerParams(
            dimension_semantics=("parallel", "parallel"),
            vmem_limit_bytes=vmem_limit,
        ),
        cost_estimate=pl.CostEstimate(
            flops=b * s * d,
            transcendentals=0,
            bytes_accessed=(2 * b * s * d + s * d) * itemsize,
        ),
    )(x_f, pe_f)

    out = out.reshape(b, s_pad, d)
    return out[:, :s, :] if s_pad != s else out


if __name__ == "__main__":
    # Small shapes consistent with the module: batch=2, seq=8, d_model=32.
    B, S, D = 2, 8, 32
    MAX_LEN = 64  # module default is 5000; small buffer for the demo

    key = jax.random.PRNGKey(0)
    x = jax.random.normal(key, (B, S, D), dtype=jnp.float32)
    pe = _build_pe(D, MAX_LEN)

    out = jax.block_until_ready(positional_encoding(x, pe))
    ref = x + pe[None, :S, :]
    assert out.shape == (B, S, D)
    assert jnp.allclose(out, ref, atol=1e-6), "mismatch vs reference (f32, D=32)"

    # Already-lane-dense path (D % 128 == 0) in bf16 (dtype-aware sublane rounding).
    B2, S2, D2 = 2, 16, 128
    x2 = jax.random.normal(jax.random.PRNGKey(1), (B2, S2, D2), dtype=jnp.bfloat16)
    pe2 = _build_pe(D2, MAX_LEN)
    out2 = jax.block_until_ready(positional_encoding(x2, pe2))
    ref2 = x2 + pe2[None, :S2, :].astype(jnp.bfloat16)
    assert jnp.allclose(out2.astype(jnp.float32), ref2.astype(jnp.float32), atol=2e-2), \
        "mismatch vs reference (bf16, D=128)"

    # Hardened fallback path: fold factor (4) does not divide S=7 -> seq zero-padding.
    B3, S3, D3 = 2, 7, 32
    x3 = jax.random.normal(jax.random.PRNGKey(2), (B3, S3, D3), dtype=jnp.float32)
    out3 = jax.block_until_ready(positional_encoding(x3, pe))
    ref3 = x3 + pe[None, :S3, :]
    assert out3.shape == (B3, S3, D3)
    assert jnp.allclose(out3, ref3, atol=1e-6), "mismatch vs reference (padded seq)"

    print("KERNEL_OK")
</pallas_src>

<mosaic_0001>
module attributes {stable_mosaic.version = 11 : i64} {
  func.func @_pe_add_kernel(%arg0: i32, %arg1: i32, %arg2: memref<2x2x128xf32, #tpu.memory_space<vmem>>, %arg3: memref<2x128xf32, #tpu.memory_space<vmem>>, %arg4: memref<2x2x128xf32, #tpu.memory_space<vmem>>) attributes {dimension_semantics = [#tpu.dimension_semantics<parallel>, #tpu.dimension_semantics<parallel>], iteration_bounds = array<i64: 1, 1>, scalar_prefetch = 0 : i64, scratch_operands = 0 : i64, tpu.core_type = #tpu.core_type<tc>, window_params = [{transform_indices = @transform_0, window_bounds = array<i64: 2, 2, 128>}, {transform_indices = @transform_1, window_bounds = array<i64: 2, 128>}, {transform_indices = @transform_2, window_bounds = array<i64: 2, 2, 128>}]} {
    %c0 = arith.constant 0 : index
    %c0_0 = arith.constant 0 : index
    %c0_1 = arith.constant 0 : index
    %0 = vector.load %arg2[%c0, %c0_0, %c0_1] : memref<2x2x128xf32, #tpu.memory_space<vmem>>, vector<2x2x128xf32>
    %c0_2 = arith.constant 0 : index
    %c0_3 = arith.constant 0 : index
    %1 = vector.load %arg3[%c0_2, %c0_3] : memref<2x128xf32, #tpu.memory_space<vmem>>, vector<2x128xf32>
    %2 = vector.shape_cast %1 : vector<2x128xf32> to vector<1x2x128xf32>
    %3 = vector.broadcast %2 : vector<1x2x128xf32> to vector<2x2x128xf32>
    %4 = arith.addf %0, %3 : vector<2x2x128xf32>
    %c0_4 = arith.constant 0 : index
    %c0_5 = arith.constant 0 : index
    %c0_6 = arith.constant 0 : index
    %5 = vector.load %arg4[%c0_4, %c0_5, %c0_6] : memref<2x2x128xf32, #tpu.memory_space<vmem>>, vector<2x2x128xf32>
    tpu.vector_store %arg4[%c0_4, %c0_5, %c0_6], %4 {strides = array<i32>} : memref<2x2x128xf32, #tpu.memory_space<vmem>>, vector<2x2x128xf32>,
    return
  }
  func.func @transform_0(%arg0: i32, %arg1: i32) -> (i32, i32, i32) {
    %c0_i32 = arith.constant 0 : i32
    %c0_i32_0 = arith.constant 0 : i32
    return %arg1, %arg0, %c0_i32 : i32, i32, i32
  }
  func.func @transform_1(%arg0: i32, %arg1: i32) -> (i32, i32) {
    %c0_i32 = arith.constant 0 : i32
    %c0_i32_0 = arith.constant 0 : i32
    return %arg0, %c0_i32 : i32, i32
  }
  func.func @transform_2(%arg0: i32, %arg1: i32) -> (i32, i32, i32) {
    %c0_i32 = arith.constant 0 : i32
    %c0_i32_0 = arith.constant 0 : i32
    return %arg1, %arg0, %c0_i32 : i32, i32, i32
  }
}

</mosaic_0001>

<bundles_post_ra>
// kernel: tpu_custom_call.1
= control target key start
LH: loop header
LB: loop body
LE: loop exit
PB: predicated region body
PF: predicated region fallthrough
CT: control target
= control target key end

     0   :  { %7 = vsyncpa [#allocation3], 0  ;;  %s169_s0 = inlined_call_operand.hbm [shape: f32[2,2,128], index: 0, kind: input, shape index: {}]   ;;  %s170_s1 = inlined_call_operand.hbm [shape: f32[2,128], index: 1, kind: input, shape index: {}]   ;;  %s171_s2 = inlined_call_operand.hbm [shape: f32[2,2,128], index: 2, kind: output, shape index: {}]  }
   0x1   :  { %8 = vsyncpa [#allocation6], 0 }
   0x2   :  { %9 = vsyncpa [#allocation4], 0  ;;  %s134_s9 = smov [#allocation2]  }
   0x3   :  { %s15_s10 = sshll.u32 %s134_s9, 4  ;;  %s16_s10 = int_to_ptr.vmem [resolvable:$true] %s15_s10 }
   0x4   :  { %s76_s11 = scalar_lea.vmem %s16_s10, 64  ;;  %p81_p1 = scmp.lt.s32.totalorder %s16_s10, %s16_s10 }
   0x5   :  { %p77_p0 = scmp.ne.s32.totalorder %s16_s10, %s76_s11  ;;  %p82_p2 = scmp.lt.s32.totalorder %s76_s11, %s76_s11 }
   0x7   :  { %p83_p3 = por %p82_p2, %p81_p1 }
   0x9   :  { %p84_p4 = pnand %p83_p3, %p77_p0 }
   0xb   :  { %87 = shalt.err (!%p84_p4)
}
   0xc   :  { %s135_s12 = smov 32   ;;  %s136_s13 = smov 2  }
   0xd   :  { %21 = dma.hbm_to_vmem [thread:$0]  %s169_s0, 64, %s16_s10, [#allocation3], %s135_s12, %s135_s12, %s136_s13  }
   0xe   :  { %s137_s16 = smov [#allocation5]  }
   0xf   :  { %s28_s17 = sshll.u32 %s137_s16, 4  ;;  %s29_s17 = int_to_ptr.vmem [resolvable:$true] %s28_s17 }
  0x10   :  { %s96_s18 = scalar_lea.vmem %s29_s17, 32  ;;  %p101_p6 = scmp.lt.s32.totalorder %s29_s17, %s29_s17 }
  0x11   :  { %p97_p5 = scmp.ne.s32.totalorder %s29_s17, %s96_s18  ;;  %p102_p7 = scmp.lt.s32.totalorder %s96_s18, %s96_s18 }
  0x13   :  { %p103_p8 = por %p102_p7, %p101_p6 }
  0x15   :  { %p104_p9 = pnand %p103_p8, %p97_p5 }
  0x17   :  { %107 = shalt.err (!%p104_p9)
}
  0x18   :  { %31 = dma.hbm_to_vmem [thread:$0]  %s170_s1, 32, %s29_s17, [#allocation6]  }
  0x19   :  { %128 = dma.done.wait [#allocation3], 64  }
  0x1a   :  { %129 = vsyncadd [#allocation3], 4294967232 }
  0x1b   :  { %130 = dma.done.wait [#allocation6], 32  }
  0x1c   :  { %131 = vsyncadd [#allocation6], 4294967264  ;;  %s138_s21 = smov [#allocation7]   ;;  %v38_v0 = vld [vmem:[#allocation2] sm:$0x3] }
  0x1d   :  { %s50_s0 = sshll.u32 %s138_s21, 4  ;;  %v40_v1 = vld [vmem:[#allocation5] sm:$0x3]  ;;  %v39_v2 = vld [vmem:[#allocation2 + $0x2] sm:$0x3]  ;;  %s51_s0 = int_to_ptr.vmem [resolvable:$true] %s50_s0 }
  0x1e   :  { %v41_v3 = vadd.f32 %v40_v1, %v38_v0  ;;  %v42_v4 = vadd.f32 %v40_v1, %v39_v2  ;;  %s108_s22 = scalar_lea.vmem %s51_s0, 64  ;;  %p113_p11 = scmp.lt.s32.totalorder %s51_s0, %s51_s0 }
  0x1f   :  { %p109_p10 = scmp.ne.s32.totalorder %s51_s0, %s108_s22  ;;  %p114_p12 = scmp.lt.s32.totalorder %s108_s22, %s108_s22 }
  0x20   :  { %43 = vst [vmem:[#allocation7] sm:$0x3] %v41_v3  ;;  %44 = vst [vmem:[#allocation7 + $0x2] sm:$0x3] %v42_v4 }
  0x21   :  { %p115_p13 = por %p114_p12, %p113_p11 }
  0x23   :  { %p116_p0 = pnand %p115_p13, %p109_p10 }
  0x25   :  { %119 = shalt.err (!%p116_p0)
}
  0x26   :  { %56 = dma.vmem_to_hbm [thread:$0]  %s51_s0, 64, %s171_s2, [#allocation4], %s135_s12, %s135_s12, %s136_s13  }
  0x27   :  { %132 = dma.done.wait [#allocation4], 64  }
  0x28   :  { %133 = vsyncadd [#allocation4], 4294967232 }
  0x29   :  { %60 = vsyncpa [#allocation3], 1 }
  0x2a   :  { %61 = vsyncpa [#allocation6], 1 }
  0x2b   :  { %62 = vsyncpa [#allocation4], 1 }

</bundles_post_ra>
